<compile_context>
chip_gen: v6e
topology: v6e:2x2x1
jax: 0.10.0
libtpu: 0.0.40
codegen_flags: <defaults>
</compile_context>

<pallas_src>
import jax
import jax.numpy as jnp
import numpy as np
from jax import lax
from jax.experimental import pallas as pl
from jax.experimental.pallas import tpu as pltpu

IN_FEATURES = 28 * 28        # 784
HIDDEN = 200
OUT_FEATURES = 10

# Lane-padded (multiple-of-128) widths -> lane-dense (unmasked-vst) GEMM outputs.
HIDDEN_P = 256
OUT_P = 128

BLOCK_M = 512                # batch-row tile
MIN_SPLIT_ROWS = 128         # split a single tile across 2 TCs only if each half >= 64 rows


def _round_up(v, m):
    return ((v + m - 1) // m) * m


# ----------------------------- Pallas kernel -------------------------------

def _fused_mlp_kernel(x_ref, w1_ref, b1_ref, w2_ref, b2_ref, w3_ref, b3_ref,
                      o_ref):
    """o = relu(relu(x@w1+b1)@w2+b2)@w3 + b3, entirely in VMEM.

    Weights are bf16; activations are cast to bf16 before each dot; every
    accumulation is f32 on the MXU (preferred_element_type).
    """
    x = x_ref[...].astype(jnp.bfloat16)
    h = jnp.dot(x, w1_ref[...], preferred_element_type=jnp.float32)
    h = jnp.maximum(h + b1_ref[...], 0.0).astype(jnp.bfloat16)
    h = jnp.dot(h, w2_ref[...], preferred_element_type=jnp.float32)
    h = jnp.maximum(h + b2_ref[...], 0.0).astype(jnp.bfloat16)
    y = jnp.dot(h, w3_ref[...], preferred_element_type=jnp.float32)
    o_ref[...] = (y + b3_ref[...]).astype(o_ref.dtype)


# ------------------------------ wrapper -------------------------------------

@jax.jit
def fmlp_forward(x, packed):
    """Pallas implementation of fMLP.forward. x: (B, ...) with prod(...)==784."""
    B = x.shape[0]
    x = x.reshape(B, IN_FEATURES)

    # Pad rows only up to the sublane quantum (8).  Any bm-misalignment is
    # handled by a partial last grid tile (masked stores), so large batches
    # avoid an extra full HBM copy of x.
    m_pad = _round_up(max(B, 8), 8)
    if m_pad != B:
        x = jnp.pad(x, ((0, m_pad - B), (0, 0)))

    bm = min(BLOCK_M, m_pad)
    # v7x has 2 TensorCores: if a big-enough batch would otherwise be a single
    # grid step, split it so the "parallel" axis shards across both cores.
    if m_pad >= MIN_SPLIT_ROWS and pl.cdiv(m_pad, bm) < 2:
        bm = _round_up(pl.cdiv(m_pad, 2), 8)
    grid_m = pl.cdiv(m_pad, bm)

    out = pl.pallas_call(
        _fused_mlp_kernel,
        out_shape=jax.ShapeDtypeStruct((m_pad, OUT_P), jnp.float32),
        grid=(grid_m,),
        in_specs=[
            pl.BlockSpec((bm, IN_FEATURES), lambda i: (i, 0)),        # x tile
            pl.BlockSpec((IN_FEATURES, HIDDEN_P), lambda i: (0, 0)),  # w1 (bf16)
            pl.BlockSpec((1, HIDDEN_P), lambda i: (0, 0)),            # b1 (f32)
            pl.BlockSpec((HIDDEN_P, HIDDEN_P), lambda i: (0, 0)),     # w2 (bf16)
            pl.BlockSpec((1, HIDDEN_P), lambda i: (0, 0)),            # b2 (f32)
            pl.BlockSpec((HIDDEN_P, OUT_P), lambda i: (0, 0)),        # w3 (bf16)
            pl.BlockSpec((1, OUT_P), lambda i: (0, 0)),               # b3 (f32)
        ],
        out_specs=pl.BlockSpec((bm, OUT_P), lambda i: (i, 0)),
        compiler_params=pltpu.CompilerParams(
            dimension_semantics=("parallel",),
            vmem_limit_bytes=32 * 1024 * 1024),
    )(x, packed["w1"], packed["b1"], packed["w2"], packed["b2"],
      packed["w3"], packed["b3"])

    return out[:B, :OUT_FEATURES]


# ------------------------ one-time weight packing ----------------------------

def pack_params(p):
    """Repack PyTorch-convention weights once: (out,in) -> (K,N) bf16, zero-
    padded so K matches the padded previous-layer width and N is a multiple
    of 128.  Biases stay f32 (added after the f32 accumulator)."""
    def pack_w(w, k_pad, n_pad):
        wt = jnp.asarray(w, jnp.float32).T                  # (in, out)
        k, n = wt.shape
        wt = jnp.pad(wt, ((0, k_pad - k), (0, n_pad - n)))
        return wt.astype(jnp.bfloat16)

    def pack_b(b, n_pad):
        b = jnp.asarray(b, jnp.float32).reshape(1, -1)
        return jnp.pad(b, ((0, 0), (0, n_pad - b.shape[1])))

    return {
        "w1": pack_w(p["w1"], IN_FEATURES, HIDDEN_P),
        "b1": pack_b(p["b1"], HIDDEN_P),
        "w2": pack_w(p["w2"], HIDDEN_P, HIDDEN_P),
        "b2": pack_b(p["b2"], HIDDEN_P),
        "w3": pack_w(p["w3"], HIDDEN_P, OUT_P),
        "b3": pack_b(p["b3"], OUT_P),
    }
    # Padded hidden lanes stay exactly zero (zero weight cols + zero bias ->
    # ReLU(0)=0), so padding does not perturb the real outputs.


# -------------------------- pure-JAX reference -------------------------------

def fmlp_reference(x, p):
    hp = lax.Precision.HIGHEST
    y = x.reshape(x.shape[0], -1)
    y = jnp.maximum(jnp.dot(y, p["w1"].T, precision=hp) + p["b1"], 0.0)
    y = jnp.maximum(jnp.dot(y, p["w2"].T, precision=hp) + p["b2"], 0.0)
    return jnp.dot(y, p["w3"].T, precision=hp) + p["b3"]


# ----------------------------------- main ------------------------------------

def init_params(key):
    ks = jax.random.split(key, 6)
    f = jnp.float32
    return {
        # PyTorch-convention shapes: Linear weight (out_features, in_features).
        "w1": 0.05 * jax.random.normal(ks[0], (HIDDEN, IN_FEATURES), f),
        "b1": 0.05 * jax.random.normal(ks[1], (HIDDEN,), f),
        "w2": 0.05 * jax.random.normal(ks[2], (HIDDEN, HIDDEN), f),
        "b2": 0.05 * jax.random.normal(ks[3], (HIDDEN,), f),
        "w3": 0.05 * jax.random.normal(ks[4], (OUT_FEATURES, HIDDEN), f),
        "b3": 0.05 * jax.random.normal(ks[5], (OUT_FEATURES,), f),
    }


if __name__ == "__main__":
    key = jax.random.PRNGKey(0)
    k_x, k_p = jax.random.split(key)

    x = jax.random.normal(k_x, (2, 1, 28, 28), jnp.float32)   # flatten -> 784
    params = init_params(k_p)
    packed = pack_params(params)        # one-time repack, outside jit

    out = jax.block_until_ready(fmlp_forward(x, packed))
    assert out.shape == (2, OUT_FEATURES) and out.dtype == jnp.float32

    ref = jax.block_until_ready(fmlp_reference(x, params))
    np.testing.assert_allclose(np.asarray(out), np.asarray(ref),
                               rtol=2e-2, atol=2e-2)

    print("KERNEL_OK")
</pallas_src>

<mosaic_0001>
module attributes {stable_mosaic.version = 11 : i64} {
  func.func @_fused_mlp_kernel(%arg0: i32, %arg1: memref<8x784xf32, #tpu.memory_space<vmem>>, %arg2: memref<784x256xbf16, #tpu.memory_space<vmem>>, %arg3: memref<1x256xf32, #tpu.memory_space<vmem>>, %arg4: memref<256x256xbf16, #tpu.memory_space<vmem>>, %arg5: memref<1x256xf32, #tpu.memory_space<vmem>>, %arg6: memref<256x128xbf16, #tpu.memory_space<vmem>>, %arg7: memref<1x128xf32, #tpu.memory_space<vmem>>, %arg8: memref<8x128xf32, #tpu.memory_space<vmem>>) attributes {dimension_semantics = [#tpu.dimension_semantics<parallel>], iteration_bounds = array<i64: 1>, scalar_prefetch = 0 : i64, scratch_operands = 0 : i64, tpu.core_type = #tpu.core_type<tc>, window_params = [{transform_indices = @transform_0, window_bounds = array<i64: 8, 784>}, {pipeline_mode = #tpu.pipeline_mode<synchronous>, transform_indices = @transform_1, window_bounds = array<i64: 784, 256>}, {pipeline_mode = #tpu.pipeline_mode<synchronous>, transform_indices = @transform_2, window_bounds = array<i64: 1, 256>}, {pipeline_mode = #tpu.pipeline_mode<synchronous>, transform_indices = @transform_3, window_bounds = array<i64: 256, 256>}, {pipeline_mode = #tpu.pipeline_mode<synchronous>, transform_indices = @transform_4, window_bounds = array<i64: 1, 256>}, {pipeline_mode = #tpu.pipeline_mode<synchronous>, transform_indices = @transform_5, window_bounds = array<i64: 256, 128>}, {pipeline_mode = #tpu.pipeline_mode<synchronous>, transform_indices = @transform_6, window_bounds = array<i64: 1, 128>}, {transform_indices = @transform_7, window_bounds = array<i64: 8, 128>}]} {
    %c0 = arith.constant 0 : index
    %c0_0 = arith.constant 0 : index
    %0 = vector.load %arg1[%c0, %c0_0] : memref<8x784xf32, #tpu.memory_space<vmem>>, vector<8x784xf32>
    %1 = arith.truncf %0 : vector<8x784xf32> to vector<8x784xbf16>
    %c0_1 = arith.constant 0 : index
    %c0_2 = arith.constant 0 : index
    %2 = vector.load %arg2[%c0_1, %c0_2] : memref<784x256xbf16, #tpu.memory_space<vmem>>, vector<784x256xbf16>
    %cst = arith.constant dense<0.000000e+00> : vector<8x256xf32>
    %3 = tpu.matmul %1, %2, %cst {dimension_numbers = #tpu.dot_dimension_numbers<[1], [0], [0], [1], [0, 0, 1, 1], [], []>} : vector<8x784xbf16>, vector<784x256xbf16>, vector<8x256xf32> -> vector<8x256xf32>
    %c0_3 = arith.constant 0 : index
    %c0_4 = arith.constant 0 : index
    %4 = vector.load %arg3[%c0_3, %c0_4] : memref<1x256xf32, #tpu.memory_space<vmem>>, vector<1x256xf32>
    %5 = vector.broadcast %4 : vector<1x256xf32> to vector<8x256xf32>
    %6 = arith.addf %3, %5 : vector<8x256xf32>
    %cst_5 = arith.constant 0.000000e+00 : f32
    %7 = vector.broadcast %cst_5 : f32 to vector<8x256xf32>
    %8 = arith.maximumf %6, %7 : vector<8x256xf32>
    %9 = arith.truncf %8 : vector<8x256xf32> to vector<8x256xbf16>
    %c0_6 = arith.constant 0 : index
    %c0_7 = arith.constant 0 : index
    %10 = vector.load %arg4[%c0_6, %c0_7] : memref<256x256xbf16, #tpu.memory_space<vmem>>, vector<256x256xbf16>
    %cst_8 = arith.constant dense<0.000000e+00> : vector<8x256xf32>
    %11 = tpu.matmul %9, %10, %cst_8 {dimension_numbers = #tpu.dot_dimension_numbers<[1], [0], [0], [1], [0, 0, 1, 1], [], []>} : vector<8x256xbf16>, vector<256x256xbf16>, vector<8x256xf32> -> vector<8x256xf32>
    %c0_9 = arith.constant 0 : index
    %c0_10 = arith.constant 0 : index
    %12 = vector.load %arg5[%c0_9, %c0_10] : memref<1x256xf32, #tpu.memory_space<vmem>>, vector<1x256xf32>
    %13 = vector.broadcast %12 : vector<1x256xf32> to vector<8x256xf32>
    %14 = arith.addf %11, %13 : vector<8x256xf32>
    %cst_11 = arith.constant 0.000000e+00 : f32
    %15 = vector.broadcast %cst_11 : f32 to vector<8x256xf32>
    %16 = arith.maximumf %14, %15 : vector<8x256xf32>
    %17 = arith.truncf %16 : vector<8x256xf32> to vector<8x256xbf16>
    %c0_12 = arith.constant 0 : index
    %c0_13 = arith.constant 0 : index
    %18 = vector.load %arg6[%c0_12, %c0_13] : memref<256x128xbf16, #tpu.memory_space<vmem>>, vector<256x128xbf16>
    %cst_14 = arith.constant dense<0.000000e+00> : vector<8x128xf32>
    %19 = tpu.matmul %17, %18, %cst_14 {dimension_numbers = #tpu.dot_dimension_numbers<[1], [0], [0], [1], [0, 0, 1, 1], [], []>} : vector<8x256xbf16>, vector<256x128xbf16>, vector<8x128xf32> -> vector<8x128xf32>
    %c0_15 = arith.constant 0 : index
    %c0_16 = arith.constant 0 : index
    %20 = vector.load %arg7[%c0_15, %c0_16] : memref<1x128xf32, #tpu.memory_space<vmem>>, vector<1x128xf32>
    %21 = vector.broadcast %20 : vector<1x128xf32> to vector<8x128xf32>
    %22 = arith.addf %19, %21 : vector<8x128xf32>
    %c0_17 = arith.constant 0 : index
    %c0_18 = arith.constant 0 : index
    %23 = vector.load %arg8[%c0_17, %c0_18] : memref<8x128xf32, #tpu.memory_space<vmem>>, vector<8x128xf32>
    tpu.vector_store %arg8[%c0_17, %c0_18], %22 {strides = array<i32>} : memref<8x128xf32, #tpu.memory_space<vmem>>, vector<8x128xf32>,
    return
  }
  func.func @transform_0(%arg0: i32) -> (i32, i32) {
    %c0_i32 = arith.constant 0 : i32
    %c0_i32_0 = arith.constant 0 : i32
    return %arg0, %c0_i32 : i32, i32
  }
  func.func @transform_1(%arg0: i32) -> (i32, i32) {
    %c0_i32 = arith.constant 0 : i32
    %c0_i32_0 = arith.constant 0 : i32
    %c0_i32_1 = arith.constant 0 : i32
    return %c0_i32, %c0_i32_0 : i32, i32
  }
  func.func @transform_2(%arg0: i32) -> (i32, i32) {
    %c0_i32 = arith.constant 0 : i32
    %c0_i32_0 = arith.constant 0 : i32
    %c0_i32_1 = arith.constant 0 : i32
    return %c0_i32, %c0_i32_0 : i32, i32
  }
  func.func @transform_3(%arg0: i32) -> (i32, i32) {
    %c0_i32 = arith.constant 0 : i32
    %c0_i32_0 = arith.constant 0 : i32
    %c0_i32_1 = arith.constant 0 : i32
    return %c0_i32, %c0_i32_0 : i32, i32
  }
  func.func @transform_4(%arg0: i32) -> (i32, i32) {
    %c0_i32 = arith.constant 0 : i32
    %c0_i32_0 = arith.constant 0 : i32
    %c0_i32_1 = arith.constant 0 : i32
    return %c0_i32, %c0_i32_0 : i32, i32
  }
  func.func @transform_5(%arg0: i32) -> (i32, i32) {
    %c0_i32 = arith.constant 0 : i32
    %c0_i32_0 = arith.constant 0 : i32
    %c0_i32_1 = arith.constant 0 : i32
    return %c0_i32, %c0_i32_0 : i32, i32
  }
  func.func @transform_6(%arg0: i32) -> (i32, i32) {
    %c0_i32 = arith.constant 0 : i32
    %c0_i32_0 = arith.constant 0 : i32
    %c0_i32_1 = arith.constant 0 : i32
    return %c0_i32, %c0_i32_0 : i32, i32
  }
  func.func @transform_7(%arg0: i32) -> (i32, i32) {
    %c0_i32 = arith.constant 0 : i32
    %c0_i32_0 = arith.constant 0 : i32
    return %arg0, %c0_i32 : i32, i32
  }
}

</mosaic_0001>

<bundles_post_ra>
// kernel: fmlp_forward.1
= control target key start
LH: loop header
LB: loop body
LE: loop exit
PB: predicated region body
PF: predicated region fallthrough
CT: control target
= control target key end

     0   :  { %12 = vsyncpa [#allocation3], 0  ;;  %s1886_s0 = inlined_call_operand.vmem [shape: f32[8,784], index: 0, kind: input, shape index: {}]   ;;  %s1887_s1 = inlined_call_operand.hbm [shape: bf16[784,256], index: 1, kind: input, shape index: {}]   ;;  %s1888_s2 = inlined_call_operand.vmem [shape: f32[1,256], index: 2, kind: input, shape index: {}]   ;;  %s1889_s3 = inlined_call_operand.vmem [shape: bf16[256,256], index: 3, kind: input, shape index: {}]   ;;  %s1890_s4 = inlined_call_operand.vmem [shape: f32[1,256], index: 4, kind: input, shape index: {}]   ;;  %s1891_s5 = inlined_call_operand.hbm [shape: bf16[256,128], index: 5, kind: input, shape index: {}]   ;;  %s1892_s6 = inlined_call_operand.vmem [shape: f32[1,128], index: 6, kind: input, shape index: {}]   ;;  %s1893_s7 = inlined_call_operand.vmem [shape: f32[8,128], index: 7, kind: output, shape index: {}]  }
   0x1   :  { %13 = vsyncpa [#allocation5], 0  ;;  %s1704_s24 = smov [#allocation2]  }
   0x2   :  { %s21_s25 = sshll.u32 %s1704_s24, 4  ;;  %s22_s25 = int_to_ptr.vmem [resolvable:$true] %s21_s25 }
   0x3   :  { %s1668_s26 = scalar_lea.vmem %s22_s25, 12544  ;;  %p1673_p1 = scmp.lt.s32.totalorder %s22_s25, %s22_s25 }
   0x4   :  { %p1669_p0 = scmp.ne.s32.totalorder %s22_s25, %s1668_s26  ;;  %p1674_p2 = scmp.lt.s32.totalorder %s1668_s26, %s1668_s26 }
   0x6   :  { %p1675_p3 = por %p1674_p2, %p1673_p1 }
   0x8   :  { %p1676_p4 = pnand %p1675_p3, %p1669_p0 }
   0xa   :  { %1679 = shalt.err (!%p1676_p4)
}
   0xb   :  { %s1705_s27 = smov 128   ;;  %s1706_s28 = smov 8  }
   0xc   :  { %27 = dma.hbm_to_vmem [thread:$0]  %s1887_s1, 12544, %s22_s25, [#allocation3], %s1705_s27, %s1705_s27, %s1706_s28  }
   0xd   :  { %s1707_s8 = smov [#allocation4]  }
   0xe   :  { %s39_s9 = sshll.u32 %s1707_s8, 4  ;;  %s40_s9 = int_to_ptr.vmem [resolvable:$true] %s39_s9 }
   0xf   :  { %s1688_s10 = scalar_lea.vmem %s40_s9, 2048  ;;  %p1693_p6 = scmp.lt.s32.totalorder %s40_s9, %s40_s9 }
  0x10   :  { %p1689_p5 = scmp.ne.s32.totalorder %s40_s9, %s1688_s10  ;;  %p1694_p7 = scmp.lt.s32.totalorder %s1688_s10, %s1688_s10 }
  0x12   :  { %p1695_p8 = por %p1694_p7, %p1693_p6 }
  0x14   :  { %p1696_p9 = pnand %p1695_p8, %p1689_p5 }
  0x16   :  { %1699 = shalt.err (!%p1696_p9)
}
  0x17   :  { %s1708_s11 = smov 64   ;;  %s1709_s12 = smov 4  }
  0x18   :  { %45 = dma.hbm_to_vmem [thread:$0]  %s1891_s5, 2048, %s40_s9, [#allocation5], %s1708_s11, %s1708_s11, %s1709_s12  }
  0x19   :  { %1700 = dma.done.wait [#allocation3], 12544  }
  0x1a   :  { %1701 = vsyncadd [#allocation3], 4294954752 }
  0x1b   :  { %1702 = dma.done.wait [#allocation5], 2048  }
  0x1c   :  { %1703 = vsyncadd [#allocation5], 4294965248  ;;  %v1449_v0 = vld [vmem:[#allocation2 + $0x74] ss:$8 sps:$4 sm:$0xff]   ;;  %v1451_v1 = vld [vmem:[#allocation2 + $0x70] ss:$8 sps:$4 sm:$0xff]  }
  0x1d   :  { %673 = vmatprep.subr.bf16.mxu0 %v1449_v0  ;;  %v1452_v2 = vld [vmem:[#allocation2 + $0x174] ss:$8 sps:$4 sm:$0xff]   ;;  %v1454_v3 = vld [vmem:[#allocation2 + $0x170] ss:$8 sps:$4 sm:$0xff]   ;;  %v1455_v4 = vld [vmem:[#allocation2 + $0x64] ss:$8 sps:$4 sm:$0xff]  }
  0x1e   :  { %674 = vmatpush1.bf16.msra.mxu0 %v1451_v1  ;;  %v1457_v5 = vld [vmem:[#allocation2 + $0x60] ss:$8 sps:$4 sm:$0xff]   ;;  %714 = vmatprep.subr.bf16.mxu1 %v1452_v2  ;;  %v1458_v6 = vld [vmem:[#allocation2 + $0x164] ss:$8 sps:$4 sm:$0xff]   ;;  %v1461_v8 = vld [vmem:[#allocation2 + $0x54] ss:$8 sps:$4 sm:$0xff]  }
  0x1f   :  { %715 = vmatpush1.bf16.msra.mxu1 %v1454_v3  ;;  %675 = vmatprep.subr.bf16.mxu0 %v1455_v4  ;;  %v1460_v7 = vld [vmem:[#allocation2 + $0x160] ss:$8 sps:$4 sm:$0xff]   ;;  %v1463_v9 = vld [vmem:[#allocation2 + $0x50] ss:$8 sps:$4 sm:$0xff]   ;;  %v1464_v10 = vld [vmem:[#allocation2 + $0x154] ss:$8 sps:$4 sm:$0xff]  }
  0x20   :  { %716 = vmatprep.subr.bf16.mxu1 %v1458_v6  ;;  %v1467_v11 = vld [vmem:[#allocation2 + $0x44] ss:$8 sps:$4 sm:$0xff]   ;;  %v1466_v12 = vld [vmem:[#allocation2 + $0x150] ss:$8 sps:$4 sm:$0xff]   ;;  %v1469_v14 = vld [vmem:[#allocation2 + $0x40] ss:$8 sps:$4 sm:$0xff]  }
  0x21   :  { %v1470_v13 = vld [vmem:[#allocation2 + $0x144] ss:$8 sps:$4 sm:$0xff]   ;;  %v1473_v15 = vld [vmem:[#allocation2 + $0x34] ss:$8 sps:$4 sm:$0xff]   ;;  %v1472_v16 = vld [vmem:[#allocation2 + $0x140] ss:$8 sps:$4 sm:$0xff]  }
  0x22   :  { %676 = vmatpush1.bf16.msra.mxu0 %v1457_v5  ;;  %v1476_v17 = vld [vmem:[#allocation2 + $0x134] ss:$8 sps:$4 sm:$0xff]   ;;  %v1475_v18 = vld [vmem:[#allocation2 + $0x30] ss:$8 sps:$4 sm:$0xff]   ;;  %v1479_v19 = vld [vmem:[#allocation2 + $0x24] ss:$8 sps:$4 sm:$0xff]  }
  0x23   :  { %677 = vmatprep.subr.bf16.mxu0 %v1461_v8  ;;  %717 = vmatpush1.bf16.msra.mxu1 %v1460_v7  ;;  %v1478_v20 = vld [vmem:[#allocation2 + $0x130] ss:$8 sps:$4 sm:$0xff]   ;;  %v1482_v21 = vld [vmem:[#allocation2 + $0x124] ss:$8 sps:$4 sm:$0xff]   ;;  %v1481_v22 = vld [vmem:[#allocation2 + $0x20] ss:$8 sps:$4 sm:$0xff]  }
  0x24   :  { %718 = vmatprep.subr.bf16.mxu1 %v1464_v10  ;;  %v1485_v23 = vld [vmem:[#allocation2 + $0x14] ss:$8 sps:$4 sm:$0xff]   ;;  %v1484_v24 = vld [vmem:[#allocation2 + $0x120] ss:$8 sps:$4 sm:$0xff]   ;;  %v1487_v26 = vld [vmem:[#allocation2 + $0x10] ss:$8 sps:$4 sm:$0xff]  }
  0x25   :  { %v1488_v25 = vld [vmem:[#allocation2 + $0x114] ss:$8 sps:$4 sm:$0xff]   ;;  %v1491_v27 = vld [vmem:[#allocation2 + $0x4] ss:$8 sps:$4 sm:$0xff]   ;;  %v1490_v28 = vld [vmem:[#allocation2 + $0x110] ss:$8 sps:$4 sm:$0xff]  }
  0x26   :  { %678 = vmatpush1.bf16.msra.mxu0 %v1463_v9  ;;  %v1494_v29 = vld [vmem:[#allocation2 + $0x104] ss:$8 sps:$4 sm:$0xff]   ;;  %v1493_v30 = vld [vmem:[#allocation2] ss:$8 sps:$4 sm:$0xff]   ;;  %v1497_v31 = vld [vmem:[#allocation2 + $0xf4] ss:$8 sps:$4 sm:$0xff]  }
  0x27   :  { %679 = vmatprep.subr.bf16.mxu0 %v1467_v11  ;;  %719 = vmatpush1.bf16.msra.mxu1 %v1466_v12  ;;  %v1496_v32 = vld [vmem:[#allocation2 + $0x100] ss:$8 sps:$4 sm:$0xff]   ;;  %v1500_v33 = vld [vmem:[#allocation2 + $0x1f4] ss:$8 sps:$4 sm:$0xff]   ;;  %v1499_v34 = vld [vmem:[#allocation2 + $0xf0] ss:$8 sps:$4 sm:$0xff]  }
  0x28   :  { %720 = vmatprep.subr.bf16.mxu1 %v1470_v13  ;;  %v1503_v35 = vld [vmem:[#allocation2 + $0xe4] ss:$8 sps:$4 sm:$0xff]   ;;  %v1502_v36 = vld [vmem:[#allocation2 + $0x1f0] ss:$8 sps:$4 sm:$0xff]   ;;  %v1505_v38 = vld [vmem:[#allocation2 + $0xe0] ss:$8 sps:$4 sm:$0xff]  }
  0x29   :  { %v1506_v37 = vld [vmem:[#allocation2 + $0x1e4] ss:$8 sps:$4 sm:$0xff]   ;;  %v1509_v39 = vld [vmem:[#allocation2 + $0xd4] ss:$8 sps:$4 sm:$0xff]   ;;  %v1508_v40 = vld [vmem:[#allocation2 + $0x1e0] ss:$8 sps:$4 sm:$0xff]  }
  0x2a   :  { %680 = vmatpush1.bf16.msra.mxu0 %v1469_v14  ;;  %v1512_v41 = vld [vmem:[#allocation2 + $0x1d4] ss:$8 sps:$4 sm:$0xff]   ;;  %v1511_v42 = vld [vmem:[#allocation2 + $0xd0] ss:$8 sps:$4 sm:$0xff]   ;;  %v1515_v43 = vld [vmem:[#allocation2 + $0xc4] ss:$8 sps:$4 sm:$0xff]  }
  0x2b   :  { %681 = vmatprep.subr.bf16.mxu0 %v1473_v15  ;;  %721 = vmatpush1.bf16.msra.mxu1 %v1472_v16  ;;  %v1514_v44 = vld [vmem:[#allocation2 + $0x1d0] ss:$8 sps:$4 sm:$0xff]   ;;  %v1518_v45 = vld [vmem:[#allocation2 + $0x1c4] ss:$8 sps:$4 sm:$0xff]   ;;  %v1517_v47 = vld [vmem:[#allocation2 + $0xc0] ss:$8 sps:$4 sm:$0xff]  }
  0x2c   :  { %722 = vmatprep.subr.bf16.mxu1 %v1476_v17  ;;  %v56_v46 = vld [vmem:[%s1886_s0 + $0x8] sm:$0xff]  ;;  %v1521_v49 = vld [vmem:[#allocation2 + $0xb4] ss:$8 sps:$4 sm:$0xff]   ;;  %v1523_v54 = vld [vmem:[#allocation2 + $0xb0] ss:$8 sps:$4 sm:$0xff]   ;;  %vm669_vm0 = vcmask 130048  }
  0x2d   :  { %v63_v48 = vpack.c.bf16 %v56_v46, %v56_v46  ;;  %v58_v50 = vld [vmem:[%s1886_s0 + $0x18] sm:$0xff]  ;;  %v1520_v51 = vld [vmem:[#allocation2 + $0x1c0] ss:$8 sps:$4 sm:$0xff]   ;;  %v1527_v55 = vld [vmem:[#allocation2 + $0xa4] ss:$8 sps:$4 sm:$0xff]  }
  0x2e   :  { %682 = vmatpush1.bf16.msra.mxu0 %v1475_v18  ;;  %v65_v52 = vpack.c.bf16 %v58_v50, %v58_v50  ;;  %v1524_v53 = vld [vmem:[#allocation2 + $0x1b4] ss:$8 sps:$4 sm:$0xff]   ;;  %v1526_v56 = vld [vmem:[#allocation2 + $0x1b0] ss:$8 sps:$4 sm:$0xff]   ;;  %v1530_v57 = vld [vmem:[#allocation2 + $0x1a4] ss:$8 sps:$4 sm:$0xff]  }
  0x2f   :  { %683 = vmatprep.subr.bf16.mxu0 %v1479_v19  ;;  %723 = vmatpush1.bf16.msra.mxu1 %v1478_v20  ;;  %v1529_v58 = vld [vmem:[#allocation2 + $0xa0] ss:$8 sps:$4 sm:$0xff]   ;;  %v1533_v59 = vld [vmem:[#allocation2 + $0x94] ss:$8 sps:$4 sm:$0xff]   ;;  %v1535_v62 = vld [vmem:[#allocation2 + $0x90] ss:$8 sps:$4 sm:$0xff]  }
  0x30   :  { %724 = vmatprep.subr.bf16.mxu1 %v1482_v21  ;;  %705 = vmatprep.mubr.bf16.mxu0 %v63_v48  ;;  %v1532_v60 = vld [vmem:[#allocation2 + $0x1a0] ss:$8 sps:$4 sm:$0xff]   ;;  %v1536_v61 = vld [vmem:[#allocation2 + $0x194] ss:$8 sps:$4 sm:$0xff]   ;;  %v1539_v63 = vld [vmem:[#allocation2 + $0x84] ss:$8 sps:$4 sm:$0xff]  }
  0x31   :  { %746 = vmatprep.mubr.bf16.mxu1 %v65_v52  ;;  %v1538_v0 = vld [vmem:[#allocation2 + $0x190] ss:$8 sps:$4 sm:$0xff]   ;;  %v1541_v1 = vld [vmem:[#allocation2 + $0x80] ss:$8 sps:$4 sm:$0xff]   ;;  %v1542_v2 = vld [vmem:[#allocation2 + $0x184] ss:$8 sps:$4 sm:$0xff]  }
  0x32   :  { %684 = vmatpush1.bf16.msra.mxu0 %v1481_v22  ;;  %v1544_v3 = vld [vmem:[#allocation2 + $0x180] ss:$8 sps:$4 sm:$0xff]   ;;  %v1547_v5 = vld [vmem:[#allocation2 + $0x274] ss:$8 sps:$4 sm:$0xff]   ;;  %v1545_v8 = vld [vmem:[#allocation2 + $0x270] ss:$8 sps:$4 sm:$0xff]  }
  0x33   :  { %685 = vmatprep.subr.bf16.mxu0 %v1485_v23  ;;  %725 = vmatpush1.bf16.msra.mxu1 %v1484_v24  ;;  %v55_v4 = vld [vmem:[%s1886_s0] sm:$0xff]  ;;  %v57_v6 = vld [vmem:[%s1886_s0 + $0x10] sm:$0xff]  ;;  %v60_v16 = vld [vmem:[%s1886_s0 + $0x28] sm:$0xff]  ;;  %v1710_v19 = vmov 0  }
  0x34   :  { %726 = vmatprep.subr.bf16.mxu1 %v1488_v25  ;;  %v62_v7 = vpack.c.bf16 %v55_v4, %v55_v4  ;;  %v1550_v9 = vld [vmem:[#allocation2 + $0x264] ss:$8 sps:$4 sm:$0xff]   ;;  %v64_v10 = vpack.c.bf16 %v57_v6, %v57_v6  ;;  %v1590_v11 = vld [vmem:[#allocation2 + $0x300] ss:$8 sps:$4 sm:$0xff]   ;;  %v1553_v14 = vld [vmem:[#allocation2 + $0x254] ss:$8 sps:$4 sm:$0xff]   ;;  %v67_v17 = vpack.c.bf16 %v60_v16, %v60_v16 }
  0x35   :  { %v1592_v12 = vld [vmem:[#allocation2 + $0x304] ss:$8 sps:$4 sm:$0xff]   ;;  %v1548_v13 = vld [vmem:[#allocation2 + $0x260] ss:$8 sps:$4 sm:$0xff]   ;;  %v61_v15 = vld [vmem:[%s1886_s0 + $0x30] sm:$0xff] }
  0x36   :  { %686 = vmatpush1.bf16.msra.mxu0 %v1487_v26  ;;  %v1551_v18 = vld [vmem:[#allocation2 + $0x250] ss:$8 sps:$4 sm:$0xff]   ;;  %v1556_v20 = vld [vmem:[#allocation2 + $0x244] ss:$8 sps:$4 sm:$0xff]   ;;  %v68_v21 = vpack.c.bf16 %v61_v15, %v61_v15  ;;  %v1554_v22 = vld [vmem:[#allocation2 + $0x240] ss:$8 sps:$4 sm:$0xff]  }
  0x37   :  { %687 = vmatprep.subr.bf16.mxu0 %v1491_v27  ;;  %727 = vmatpush1.bf16.msra.mxu1 %v1490_v28  ;;  %v1559_v23 = vld [vmem:[#allocation2 + $0x234] ss:$8 sps:$4 sm:$0xff]   ;;  %v1557_v24 = vld [vmem:[#allocation2 + $0x230] ss:$8 sps:$4 sm:$0xff]   ;;  %v1562_v25 = vld [vmem:[#allocation2 + $0x224] ss:$8 sps:$4 sm:$0xff]  }
  0x38   :  { %728 = vmatprep.subr.bf16.mxu1 %v1494_v29  ;;  %v1560_v26 = vld [vmem:[#allocation2 + $0x220] ss:$8 sps:$4 sm:$0xff]   ;;  %v1565_v27 = vld [vmem:[#allocation2 + $0x214] ss:$8 sps:$4 sm:$0xff]   ;;  %v1563_v28 = vld [vmem:[#allocation2 + $0x210] ss:$8 sps:$4 sm:$0xff]  }
  0x39   :  { %v1568_v29 = vld [vmem:[#allocation2 + $0x204] ss:$8 sps:$4 sm:$0xff]   ;;  %v1593_v46 = vld [vmem:[#allocation2 + $0x280] ss:$8 sps:$4 sm:$0xff]   ;;  %v1598_v50 = vld [vmem:[%s1889_s3 + $0x74] ss:$8 sps:$4 sm:$0xff]  }
  0x3a   :  { %688 = vmatpush1.bf16.msra.mxu0 %v1493_v30  ;;  %v1566_v30 = vld [vmem:[#allocation2 + $0x200] ss:$8 sps:$4 sm:$0xff]   ;;  %v1626_v6 = vld [vmem:[%s1889_s3 + $0xd0] ss:$8 sps:$4 sm:$0xff]   ;;  %v1643_v15 = vld [vmem:[%s1889_s3 + $0x84] ss:$8 sps:$4 sm:$0xff]  }
  0x3b   :  { %689 = vmatprep.subr.bf16.mxu0 %v1497_v31  ;;  %729 = vmatpush1.bf16.msra.mxu1 %v1496_v32  ;;  %v1571_v31 = vld [vmem:[#allocation2 + $0x2f4] ss:$8 sps:$4 sm:$0xff]   ;;  %v1569_v32 = vld [vmem:[#allocation2 + $0x2f0] ss:$8 sps:$4 sm:$0xff]   ;;  %v1599_v52 = vld [vmem:[%s1889_s3 + $0x60] ss:$8 sps:$4 sm:$0xff]  }
  0x3c   :  { %730 = vmatprep.subr.bf16.mxu1 %v1500_v33  ;;  %v1574_v33 = vld [vmem:[#allocation2 + $0x2e4] ss:$8 sps:$4 sm:$0xff]   ;;  %v1623_v4 = vld [vmem:[%s1889_s3 + $0xe0] ss:$8 sps:$4 sm:$0xff]  }
  0x3d   :  { %v1641_v16 = vld [vmem:[%s1889_s3 + $0x80] ss:$8 sps:$4 sm:$0xff]  }
  0x3e   :  { %690 = vmatpush2.bf16.msra.mxu0 %v1499_v34  ;;  %v1572_v34 = vld [vmem:[#allocation2 + $0x2e0] ss:$8 sps:$4 sm:$0xff]  }
  0x3f   :  { %691 = vmatprep.subr.bf16.mxu0 %v1503_v35  ;;  %731 = vmatpush2.bf16.msra.mxu1 %v1502_v36  ;;  %v1577_v35 = vld [vmem:[#allocation2 + $0x2d4] ss:$8 sps:$4 sm:$0xff]   ;;  %v1575_v36 = vld [vmem:[#allocation2 + $0x2d0] ss:$8 sps:$4 sm:$0xff]  }
  0x40   :  { %732 = vmatprep.subr.bf16.mxu1 %v1506_v37  ;;  %v1580_v37 = vld [vmem:[#allocation2 + $0x2c4] ss:$8 sps:$4 sm:$0xff]  }
  0x42   :  { %692 = vmatpush2.bf16.msra.mxu0 %v1505_v38  ;;  %v1578_v38 = vld [vmem:[#allocation2 + $0x2c0] ss:$8 sps:$4 sm:$0xff]  }
  0x43   :  { %693 = vmatprep.subr.bf16.mxu0 %v1509_v39  ;;  %733 = vmatpush2.bf16.msra.mxu1 %v1508_v40  ;;  %v1583_v39 = vld [vmem:[#allocation2 + $0x2b4] ss:$8 sps:$4 sm:$0xff]   ;;  %v1581_v40 = vld [vmem:[#allocation2 + $0x2b0] ss:$8 sps:$4 sm:$0xff]  }
  0x44   :  { %734 = vmatprep.subr.bf16.mxu1 %v1512_v41  ;;  %v1586_v41 = vld [vmem:[#allocation2 + $0x2a4] ss:$8 sps:$4 sm:$0xff]  }
  0x46   :  { %694 = vmatpush2.bf16.msra.mxu0 %v1511_v42  ;;  %v1584_v42 = vld [vmem:[#allocation2 + $0x2a0] ss:$8 sps:$4 sm:$0xff]  }
  0x47   :  { %695 = vmatprep.subr.bf16.mxu0 %v1515_v43  ;;  %735 = vmatpush2.bf16.msra.mxu1 %v1514_v44  ;;  %v1589_v43 = vld [vmem:[#allocation2 + $0x294] ss:$8 sps:$4 sm:$0xff]   ;;  %v1587_v44 = vld [vmem:[#allocation2 + $0x290] ss:$8 sps:$4 sm:$0xff]  }
  0x48   :  { %736 = vmatprep.subr.bf16.mxu1 %v1518_v45  ;;  %v1595_v45 = vld [vmem:[#allocation2 + $0x284] ss:$8 sps:$4 sm:$0xff]  }
  0x4a   :  { %696 = vmatpush2.bf16.msra.mxu0 %v1517_v47  ;;  %v59_v47 = vld [vmem:[%s1886_s0 + $0x20] sm:$0xff] }
  0x4b   :  { %697 = vmatprep.subr.bf16.mxu0 %v1521_v49  ;;  %737 = vmatpush2.bf16.msra.mxu1 %v1520_v51  ;;  %v66_v48 = vpack.c.bf16 %v59_v47, %v59_v47  ;;  %v1596_v49 = vld [vmem:[%s1889_s3 + $0x70] ss:$8 sps:$4 sm:$0xff]   ;;  %v1601_v51 = vld [vmem:[%s1889_s3 + $0x64] ss:$8 sps:$4 sm:$0xff]  }
  0x4c   :  { %738 = vmatprep.subr.bf16.mxu1 %v1524_v53  ;;  %v1604_v53 = vld [vmem:[%s1889_s3 + $0x54] ss:$8 sps:$4 sm:$0xff]  }
  0x4e   :  { %698 = vmatpush2.bf16.msra.mxu0 %v1523_v54  ;;  %v1602_v54 = vld [vmem:[%s1889_s3 + $0x50] ss:$8 sps:$4 sm:$0xff]  }
  0x4f   :  { %699 = vmatprep.subr.bf16.mxu0 %v1527_v55  ;;  %739 = vmatpush2.bf16.msra.mxu1 %v1526_v56  ;;  %v1607_v55 = vld [vmem:[%s1889_s3 + $0x44] ss:$8 sps:$4 sm:$0xff]   ;;  %v1605_v56 = vld [vmem:[%s1889_s3 + $0x40] ss:$8 sps:$4 sm:$0xff]  }
  0x50   :  { %740 = vmatprep.subr.bf16.mxu1 %v1530_v57  ;;  %v1610_v57 = vld [vmem:[%s1889_s3 + $0x34] ss:$8 sps:$4 sm:$0xff]  }
  0x52   :  { %700 = vmatpush2.bf16.msra.mxu0 %v1529_v58  ;;  %v1608_v58 = vld [vmem:[%s1889_s3 + $0x30] ss:$8 sps:$4 sm:$0xff]  }
  0x53   :  { %701 = vmatprep.subr.bf16.mxu0 %v1533_v59  ;;  %741 = vmatpush2.bf16.msra.mxu1 %v1532_v60  ;;  %v1613_v59 = vld [vmem:[%s1889_s3 + $0x24] ss:$8 sps:$4 sm:$0xff]   ;;  %v1611_v60 = vld [vmem:[%s1889_s3 + $0x20] ss:$8 sps:$4 sm:$0xff]  }
  0x54   :  { %742 = vmatprep.subr.bf16.mxu1 %v1536_v61  ;;  %v1616_v61 = vld [vmem:[%s1889_s3 + $0x14] ss:$8 sps:$4 sm:$0xff]  }
  0x56   :  { %702 = vmatpush2.bf16.msra.mxu0 %v1535_v62  ;;  %v1614_v62 = vld [vmem:[%s1889_s3 + $0x10] ss:$8 sps:$4 sm:$0xff]  }
  0x57   :  { %703 = vmatprep.subr.bf16.mxu0 %v1539_v63  ;;  %743 = vmatpush2.bf16.msra.mxu1 %v1538_v0  ;;  %v1619_v63 = vld [vmem:[%s1889_s3 + $0x4] ss:$8 sps:$4 sm:$0xff]   ;;  %v1617_v0 = vld [vmem:[%s1889_s3] ss:$8 sps:$4 sm:$0xff]  }
  0x58   :  { %744 = vmatprep.subr.bf16.mxu1 %v1542_v2  ;;  %v1620_v2 = vld [vmem:[%s1889_s3 + $0xf0] ss:$8 sps:$4 sm:$0xff]  }
  0x5a   :  { %704 = vmatpush2.bf16.msra.mxu0 %v1541_v1  ;;  %v1622_v1 = vld [vmem:[%s1889_s3 + $0xf4] ss:$8 sps:$4 sm:$0xff]  }
  0x5b   :  { %755 = vmatprep.subr.bf16.mxu0 %v1547_v5  ;;  %745 = vmatpush2.bf16.msra.mxu1 %v1544_v3  ;;  %v1625_v3 = vld [vmem:[%s1889_s3 + $0xe4] ss:$8 sps:$4 sm:$0xff]   ;;  %v1628_v5 = vld [vmem:[%s1889_s3 + $0xd4] ss:$8 sps:$4 sm:$0xff]  }
  0x5c   :  { %810 = vmatprep.subr.bf16.mxu1 %v1592_v12  ;;  %v1635_v12 = vld [vmem:[%s1889_s3 + $0xa0] ss:$8 sps:$4 sm:$0xff]  }
  0x5d   :  { %706 = vmatmul.mubr.bf16.vlgmr.msra.gmra.mxu0 %v62_v7  ;;  %v1631_v7 = vld [vmem:[%s1889_s3 + $0xc4] ss:$8 sps:$4 sm:$0xff]  }
  0x5e   :  { %756 = vmatpush1.bf16.msra.mxu0 %v1545_v8  ;;  %747 = vmatmul.mubr.bf16.vlgmr.msra.gmra.mxu1 %v64_v10  ;;  %v1629_v8 = vld [vmem:[%s1889_s3 + $0xc0] ss:$8 sps:$4 sm:$0xff]   ;;  %v1632_v10 = vld [vmem:[%s1889_s3 + $0xb0] ss:$8 sps:$4 sm:$0xff]  }
  0x5f   :  { %757 = vmatprep.subr.bf16.mxu0 %v1550_v9  ;;  %811 = vmatpush1.bf16.msra.mxu1 %v1590_v11  ;;  %v1634_v9 = vld [vmem:[%s1889_s3 + $0xb4] ss:$8 sps:$4 sm:$0xff]   ;;  %v1637_v11 = vld [vmem:[%s1889_s3 + $0xa4] ss:$8 sps:$4 sm:$0xff]  }
  0x60   :  { %828 = vmatprep.mubr.bf16.mxu1 %v1710_v19  ;;  %787 = vmatprep.mubr.bf16.mxu0 %v67_v17  ;;  %v1644_v17 = vld [vmem:[#allocation4 + $0x78] sm:$0xff]   ;;  %v1646_v19 = vld [vmem:[#allocation4 + $0x70] sm:$0xff]  }
  0x61   :  { %1045 = vmatprep.subr.bf16.mxu1 %v1598_v50 }
  0x62   :  { %758 = vmatpush1.bf16.msra.mxu0 %v1548_v13  ;;  %v1640_v13 = vld [vmem:[%s1889_s3 + $0x94] ss:$8 sps:$4 sm:$0xff]  }
  0x63   :  { %759 = vmatprep.subr.bf16.mxu0 %v1553_v14  ;;  %v1638_v14 = vld [vmem:[%s1889_s3 + $0x90] ss:$8 sps:$4 sm:$0xff]  }
  0x66   :  { %760 = vmatpush1.bf16.msra.mxu0 %v1551_v18  ;;  %1370 = vmatmul.mubr.msk.bf16.vlgmr.msra.gmra.mxu1 %vm669_vm0, %v68_v21  ;;  %v1645_v18 = vld [vmem:[#allocation4 + $0x38] sm:$0xff]   ;;  %v1648_v21 = vld [vmem:[#allocation4 + $0x68] sm:$0xff]  }
  0x67   :  { %761 = vmatprep.subr.bf16.mxu0 %v1556_v20  ;;  %1046 = vmatpush1.bf16.msra.mxu1 %v1596_v49  ;;  %v1647_v20 = vld [vmem:[#allocation4 + $0x30] sm:$0xff]  }
  0x68   :  { %1047 = vmatprep.subr.bf16.mxu1 %v1601_v51 }
  0x6a   :  { %762 = vmatpush1.bf16.msra.mxu0 %v1554_v22  ;;  %v1649_v22 = vld [vmem:[#allocation4 + $0x28] sm:$0xff]  }
  0x6b   :  { %763 = vmatprep.subr.bf16.mxu0 %v1559_v23  ;;  %1048 = vmatpush1.bf16.msra.mxu1 %v1599_v52  ;;  %v1650_v23 = vld [vmem:[#allocation4 + $0x60] sm:$0xff]  }
  0x6c   :  { %1049 = vmatprep.subr.bf16.mxu1 %v1604_v53 }
  0x6e   :  { %764 = vmatpush1.bf16.msra.mxu0 %v1557_v24  ;;  %v1651_v24 = vld [vmem:[#allocation4 + $0x20] sm:$0xff]  }
  0x6f   :  { %765 = vmatprep.subr.bf16.mxu0 %v1562_v25  ;;  %1050 = vmatpush1.bf16.msra.mxu1 %v1602_v54  ;;  %v1652_v25 = vld [vmem:[#allocation4 + $0x58] sm:$0xff]  }
  0x70   :  { %1051 = vmatprep.subr.bf16.mxu1 %v1607_v55 }
  0x72   :  { %766 = vmatpush1.bf16.msra.mxu0 %v1560_v26  ;;  %v1653_v26 = vld [vmem:[#allocation4 + $0x18] sm:$0xff]  }
  0x73   :  { %767 = vmatprep.subr.bf16.mxu0 %v1565_v27  ;;  %1052 = vmatpush1.bf16.msra.mxu1 %v1605_v56  ;;  %v1654_v27 = vld [vmem:[#allocation4 + $0x50] sm:$0xff]  }
  0x74   :  { %1053 = vmatprep.subr.bf16.mxu1 %v1610_v57 }
  0x76   :  { %768 = vmatpush1.bf16.msra.mxu0 %v1563_v28  ;;  %v1655_v28 = vld [vmem:[#allocation4 + $0x10] sm:$0xff]  }
  0x77   :  { %769 = vmatprep.subr.bf16.mxu0 %v1568_v29  ;;  %1054 = vmatpush1.bf16.msra.mxu1 %v1608_v58 }
  0x78   :  { %1055 = vmatprep.subr.bf16.mxu1 %v1613_v59 }
  0x7a   :  { %770 = vmatpush1.bf16.msra.mxu0 %v1566_v30 }
  0x7b   :  { %771 = vmatprep.subr.bf16.mxu0 %v1571_v31  ;;  %1056 = vmatpush1.bf16.msra.mxu1 %v1611_v60 }
  0x7c   :  { %1057 = vmatprep.subr.bf16.mxu1 %v1616_v61 }
  0x7e   :  { %772 = vmatpush2.bf16.msra.mxu0 %v1569_v32 }
  0x7f   :  { %773 = vmatprep.subr.bf16.mxu0 %v1574_v33  ;;  %1058 = vmatpush1.bf16.msra.mxu1 %v1614_v62 }
  0x80   :  { %1059 = vmatprep.subr.bf16.mxu1 %v1619_v63 }
  0x82   :  { %774 = vmatpush2.bf16.msra.mxu0 %v1572_v34 }
  0x83   :  { %775 = vmatprep.subr.bf16.mxu0 %v1577_v35  ;;  %1060 = vmatpush1.bf16.msra.mxu1 %v1617_v0  ;;  %v1656_v0 = vld [vmem:[#allocation4 + $0x48] sm:$0xff]  }
  0x84   :  { %1061 = vmatprep.subr.bf16.mxu1 %v1622_v1  ;;  %v1657_v1 = vld [vmem:[#allocation4 + $0x8] sm:$0xff]  }
  0x86   :  { %776 = vmatpush2.bf16.msra.mxu0 %v1575_v36 }
  0x87   :  { %777 = vmatprep.subr.bf16.mxu0 %v1580_v37  ;;  %1062 = vmatpush2.bf16.msra.mxu1 %v1620_v2  ;;  %v1658_v2 = vld [vmem:[#allocation4 + $0x40] sm:$0xff]  }
  0x88   :  { %1063 = vmatprep.subr.bf16.mxu1 %v1625_v3  ;;  %v1659_v3 = vld [vmem:[#allocation4] sm:$0xff]  }
  0x8a   :  { %778 = vmatpush2.bf16.msra.mxu0 %v1578_v38 }
  0x8b   :  { %779 = vmatprep.subr.bf16.mxu0 %v1583_v39  ;;  %1064 = vmatpush2.bf16.msra.mxu1 %v1623_v4  ;;  %v873_v4 = vld [vmem:[%s1890_s4] sm:$0x3] }
  0x8c   :  { %1065 = vmatprep.subr.bf16.mxu1 %v1628_v5 }
  0x8e   :  { %780 = vmatpush2.bf16.msra.mxu0 %v1581_v40 }
  0x8f   :  { %781 = vmatprep.subr.bf16.mxu0 %v1586_v41  ;;  %1066 = vmatpush2.bf16.msra.mxu1 %v1626_v6  ;;  %v169_v41 = vlaneseq }
  0x90   :  { %1067 = vmatprep.subr.bf16.mxu1 %v1631_v7 }
  0x92   :  { %782 = vmatpush2.bf16.msra.mxu0 %v1584_v42  ;;  %v170_v42 = vshrl.u32 %v169_v41, 7 }
  0x93   :  { %783 = vmatprep.subr.bf16.mxu0 %v1589_v43  ;;  %1068 = vmatpush2.bf16.msra.mxu1 %v1629_v8 }
  0x94   :  { %1069 = vmatprep.subr.bf16.mxu1 %v1634_v9  ;;  %v171_v43 = vsub.s32 0, %v170_v42 }
  0x96   :  { %784 = vmatpush2.bf16.msra.mxu0 %v1587_v44  ;;  %v167_v44 = vld [vmem:[%s1888_s2] sm:$0x3]  ;;  %v878_v5 = vrot.slane %v873_v4, %v171_v43 }
  0x97   :  { %785 = vmatprep.subr.bf16.mxu0 %v1595_v45  ;;  %1070 = vmatpush2.bf16.msra.mxu1 %v1632_v10  ;;  %v175_v45 = vsub.s32 1, %v170_v42 }
  0x98   :  { %1071 = vmatprep.subr.bf16.mxu1 %v1637_v11 }
  0x99   :  { %v176_v47 = vrot.slane %v167_v44, %v175_v45  ;;  %v882_v6 = vrot.slane %v873_v4, %v175_v45 }
  0x9a   :  { %786 = vmatpush2.bf16.msra.mxu0 %v1593_v46  ;;  %v172_v46 = vrot.slane %v167_v44, %v171_v43 }
  0x9b   :  { %1072 = vmatpush2.bf16.msra.mxu1 %v1635_v12  ;;  %1420 = vmatprep.subr.bf16.mxu0 %v1644_v17 }
  0x9c   :  { %1073 = vmatprep.subr.bf16.mxu1 %v1640_v13 }
  0x9d   :  { %788 = vmatmul.mubr.bf16.vlgmr.msra.gmra.mxu0 %v66_v48 }
  0x9e   :  { %1421 = vmatpush3.bf16.msra.mxu0 %v1645_v18  ;;  %v1403_v18 = vld [vmem:[%s1892_s6] ss:$0 sm:$0xff] }
  0x9f   :  { %1074 = vmatpush2.bf16.msra.mxu1 %v1638_v14  ;;  %1422 = vmatprep.subr.bf16.mxu0 %v1646_v19 }
  0xa0   :  { %1075 = vmatprep.subr.bf16.mxu1 %v1643_v15 }
  0xa2   :  { %1423 = vmatpush3.bf16.msra.mxu0 %v1647_v20 }
  0xa3   :  { %1076 = vmatpush2.bf16.msra.mxu1 %v1641_v16  ;;  %1424 = vmatprep.subr.bf16.mxu0 %v1648_v21 }
  0xa6   :  { %1425 = vmatpush3.bf16.msra.mxu0 %v1649_v22 }
  0xa7   :  { %1426 = vmatprep.subr.bf16.mxu0 %v1650_v23 }
  0xaa   :  { %1427 = vmatpush3.bf16.msra.mxu0 %v1651_v24 }
  0xab   :  { %1428 = vmatprep.subr.bf16.mxu0 %v1652_v25 }
  0xae   :  { %1429 = vmatpush3.bf16.msra.mxu0 %v1653_v26 }
  0xaf   :  { %1430 = vmatprep.subr.bf16.mxu0 %v1654_v27 }
  0xb2   :  { %1431 = vmatpush3.bf16.msra.mxu0 %v1655_v28 }
  0xb3   :  { %1432 = vmatprep.subr.bf16.mxu0 %v1656_v0 }
  0xb6   :  { %1433 = vmatpush3.bf16.msra.mxu0 %v1657_v1 }
  0xb7   :  { %1434 = vmatprep.subr.bf16.mxu0 %v1658_v2 }
  0xba   :  { %1435 = vmatpush3.bf16.msra.mxu0 %v1659_v3 }
 0x11d   :  { %v707_v29 = vpop.f32.mrf.mxu0 }
 0x11e   :  { %v748_v31 = vpop.f32.mrf.mxu1  ;;  %v708_v48 = vadd.f32 %v707_v29, %v172_v46 }
 0x11f   :  { %v709_v30 = vpop.f32.mrf.mxu0 }
 0x120   :  { %v750_v33 = vpop.f32.mrf.mxu1  ;;  %v710_v49 = vadd.f32 %v709_v30, %v176_v47  ;;  %v749_v50 = vadd.f32 %v748_v31, %v708_v48 }
 0x121   :  { %v711_v32 = vpop.f32.mrf.mxu0 }
 0x122   :  { %v752_v35 = vpop.f32.mrf.mxu1  ;;  %v751_v52 = vadd.f32 %v750_v33, %v710_v49 }
 0x123   :  { %v712_v34 = vpop.f32.mrf.mxu0 }
 0x124   :  { %v753_v36 = vpop.f32.mrf.mxu1 }
 0x126   :  { %v830_v37 = vpop.f32.mrf.mxu1 }
 0x128   :  { %v832_v38 = vpop.f32.mrf.mxu1 }
 0x12a   :  { %v834_v39 = vpop.f32.mrf.mxu1 }
 0x12c   :  { %v835_v40 = vpop.f32.mrf.mxu1 }
 0x15d   :  { %v789_v51 = vpop.f32.mrf.mxu0 }
 0x15e   :  { %v790_v53 = vadd.f32 %v789_v51, %v749_v50 }
 0x15f   :  { %v791_v54 = vpop.f32.mrf.mxu0 }
 0x160   :  { %v831_v55 = vadd.f32 %v830_v37, %v790_v53  ;;  %v792_v56 = vadd.f32 %v791_v54, %v751_v52 }
 0x161   :  { %v793_v57 = vpop.f32.mrf.mxu0 }
 0x162   :  { %v833_v58 = vadd.f32 %v832_v38, %v792_v56  ;;  %v837_v59 = vmax.f32 %v831_v55, 0.0 }
 0x163   :  { %v794_v60 = vpop.f32.mrf.mxu0 }
 0x164   :  { %v838_v61 = vmax.f32 %v833_v58, 0.0  ;;  %v839_v63 = vpack.c.bf16 %v837_v59, %v837_v59 }
 0x166   :  { %v840_v62 = vpack.c.bf16 %v838_v61, %v838_v61 }
 0x168   :  { %1077 = vmatprep.mubr.bf16.mxu1 %v840_v62 }
 0x169   :  { %1078 = vmatmul.mubr.bf16.vlgmr.msra.gmra.mxu1 %v839_v63 }
 0x229   :  { %v1079_v7 = vpop.f32.mrf.mxu1 }
 0x22a   :  { %v1080_v8 = vadd.f32 %v1079_v7, %v878_v5 }
 0x22b   :  { %v1081_v9 = vpop.f32.mrf.mxu1 }
 0x22c   :  { %v1082_v10 = vadd.f32 %v1081_v9, %v882_v6  ;;  %v1086_v11 = vmax.f32 %v1080_v8, 0.0 }
 0x22d   :  { %v1083_v12 = vpop.f32.mrf.mxu1 }
 0x22e   :  { %v1087_v13 = vmax.f32 %v1082_v10, 0.0  ;;  %v1088_v16 = vpack.c.bf16 %v1086_v11, %v1086_v11 }
 0x22f   :  { %v1084_v14 = vpop.f32.mrf.mxu1 }
 0x230   :  { %v1089_v15 = vpack.c.bf16 %v1087_v13, %v1087_v13 }
 0x232   :  { %1257 = vmatprep.mubr.bf16.mxu0 %v1089_v15 }
 0x233   :  { %1258 = vmatmul.mubr.bf16.vlgmr.msra.gmra.mxu0 %v1088_v16 }
 0x2f3   :  { %v1436_v17 = vpop.f32.mrf.mxu0 }
 0x2f5   :  { %v1437_v19 = vpop.f32.mrf.mxu0 }
 0x2f6   :  { %v1438_v20 = vadd.f32 %v1437_v19, %v1436_v17 }
 0x2f7   :  { %v1439_v21 = vpop.f32.mrf.mxu0 }
 0x2f8   :  { %v1260_v22 = vadd.f32 %v1438_v20, %v1403_v18 }
 0x2f9   :  { %v1440_v23 = vpop.f32.mrf.mxu0 }
 0x2fa   :  { %1265 = vst [vmem:[%s1893_s7] sm:$0xff] %v1260_v22 }
 0x2fb   :  { %1270 = vsyncpa [#allocation3], 1 }
 0x2fc   :  { %1271 = vsyncpa [#allocation5], 1 }

</bundles_post_ra>
